<compile_context>
chip_gen: v5e
topology: v5e:2x2
jax: 0.10.0
libtpu: 0.0.40
codegen_flags: <defaults>
</compile_context>

<pallas_src>
import functools

import jax
import jax.numpy as jnp
from jax.experimental import pallas as pl
from jax.experimental.pallas import tpu as pltpu

IN_DIM = 28 * 28      # 784
H1_DIM = 128
H2_DIM = 64
OUT_DIM = 10
OUT_PAD = 128         # lane-dense output slab width
DEFAULT_TILE_B = 512  # >= 512 ~85% of HBM roofline; fits all scoped-VMEM defaults


def _round_up(x, m):
    return ((x + m - 1) // m) * m


def mlp_kernel(x_ref, w1_ref, b1_ref, w2_ref, b2_ref, w3_ref, b3_ref, out_ref):
    # x_ref: (TILE_B, 784) bf16 ; weights bf16 ; biases (1, N) f32.
    # Three back-to-back MXU matmuls with f32 accumulation; ReLU on the VPU.
    x = x_ref[...]

    h1 = jnp.dot(x, w1_ref[...], preferred_element_type=jnp.float32) + b1_ref[...]
    h1 = jnp.maximum(h1, 0.0).astype(jnp.bfloat16)              # relu(fc1)

    h2 = jnp.dot(h1, w2_ref[...], preferred_element_type=jnp.float32) + b2_ref[...]
    h2 = jnp.maximum(h2, 0.0).astype(jnp.bfloat16)              # relu(fc2)

    # w3/b3 are zero-padded to 128 output lanes -> unmasked, lane-dense store.
    h3 = jnp.dot(h2, w3_ref[...], preferred_element_type=jnp.float32) + b3_ref[...]
    out_ref[...] = h3                                           # fc3 (logits in lanes 0..9)


@functools.partial(jax.jit, static_argnames=("tile_b",))
def neural_net_forward(x_nchw, params, tile_b=DEFAULT_TILE_B):
    w1, b1, w2, b2, w3, b3 = params
    B = x_nchw.shape[0]
    x_flat = x_nchw.reshape(B, -1)                              # nn.Flatten()

    # Batch tiling: tile must be a multiple of 8 (sublane); pad B to a multiple
    # of the tile so the grid covers it exactly (padded rows sliced off below).
    tb = min(tile_b, _round_up(B, 8))
    b_pad = _round_up(B, tb)
    if b_pad != B:
        x_flat = jnp.pad(x_flat, ((0, b_pad - B), (0, 0)))
    x_bf16 = x_flat.astype(jnp.bfloat16)

    # Weights in bf16 (HBM/VMEM traffic), biases as (1, N) f32 rows.
    w1b = w1.astype(jnp.bfloat16)
    w2b = w2.astype(jnp.bfloat16)
    w3b = jnp.pad(w3, ((0, 0), (0, OUT_PAD - OUT_DIM))).astype(jnp.bfloat16)
    b1r = b1.reshape(1, H1_DIM).astype(jnp.float32)
    b2r = b2.reshape(1, H2_DIM).astype(jnp.float32)
    b3r = jnp.pad(b3.reshape(1, OUT_DIM),
                  ((0, 0), (0, OUT_PAD - OUT_DIM))).astype(jnp.float32)

    grid = (b_pad // tb,)

    out = pl.pallas_call(
        mlp_kernel,
        out_shape=jax.ShapeDtypeStruct((b_pad, OUT_PAD), jnp.float32),
        grid_spec=pltpu.PrefetchScalarGridSpec(
            num_scalar_prefetch=0,
            grid=grid,
            in_specs=[
                pl.BlockSpec((tb, IN_DIM), lambda i: (i, 0)),        # x: streamed per tile
                pl.BlockSpec((IN_DIM, H1_DIM), lambda i: (0, 0)),    # w1: resident
                pl.BlockSpec((1, H1_DIM), lambda i: (0, 0)),         # b1
                pl.BlockSpec((H1_DIM, H2_DIM), lambda i: (0, 0)),    # w2
                pl.BlockSpec((1, H2_DIM), lambda i: (0, 0)),         # b2
                pl.BlockSpec((H2_DIM, OUT_PAD), lambda i: (0, 0)),   # w3 (padded)
                pl.BlockSpec((1, OUT_PAD), lambda i: (0, 0)),        # b3 (padded)
            ],
            out_specs=pl.BlockSpec((tb, OUT_PAD), lambda i: (i, 0)),
        ),
        compiler_params=pltpu.CompilerParams(
            dimension_semantics=("parallel",),
        ),
    )(x_bf16, w1b, b1r, w2b, b2r, w3b, b3r)

    return out[:B, :OUT_DIM]


def init_params(key):
    # PyTorch nn.Linear default init: U(-1/sqrt(fan_in), 1/sqrt(fan_in)).
    def linear(key, fan_in, fan_out):
        kw, kb = jax.random.split(key)
        bound = 1.0 / jnp.sqrt(fan_in)
        w = jax.random.uniform(kw, (fan_in, fan_out), jnp.float32, -bound, bound)
        b = jax.random.uniform(kb, (fan_out,), jnp.float32, -bound, bound)
        return w, b

    k1, k2, k3 = jax.random.split(key, 3)
    w1, b1 = linear(k1, IN_DIM, H1_DIM)
    w2, b2 = linear(k2, H1_DIM, H2_DIM)
    w3, b3 = linear(k3, H2_DIM, OUT_DIM)
    return (w1, b1, w2, b2, w3, b3)


def reference_forward(x_nchw, params):
    # Plain-JAX reference mirroring the kernel math (bf16 operands, f32 accumulation).
    w1, b1, w2, b2, w3, b3 = params
    B = x_nchw.shape[0]
    x = x_nchw.reshape(B, -1).astype(jnp.bfloat16)
    h1 = jnp.dot(x, w1.astype(jnp.bfloat16), preferred_element_type=jnp.float32) + b1
    h1 = jnp.maximum(h1, 0.0).astype(jnp.bfloat16)
    h2 = jnp.dot(h1, w2.astype(jnp.bfloat16), preferred_element_type=jnp.float32) + b2
    h2 = jnp.maximum(h2, 0.0).astype(jnp.bfloat16)
    h3 = jnp.dot(h2, w3.astype(jnp.bfloat16), preferred_element_type=jnp.float32) + b3
    return h3


if __name__ == "__main__":
    key = jax.random.PRNGKey(0)
    k_params, k_x = jax.random.split(key)

    params = init_params(k_params)
    # Small MNIST-like batch: NCHW (B=2, C=1, H=28, W=28).
    x = jax.random.normal(k_x, (2, 1, 28, 28), jnp.float32)

    out = neural_net_forward(x, params)
    jax.block_until_ready(out)

    ref = reference_forward(x, params)
    assert out.shape == (2, OUT_DIM)
    assert jnp.allclose(out, ref, atol=1e-2, rtol=1e-2)

    print("KERNEL_OK")
</pallas_src>

<mosaic_0001>
module attributes {stable_mosaic.version = 11 : i64} {
  func.func @mlp_kernel(%arg0: i32, %arg1: memref<8x784xbf16, #tpu.memory_space<vmem>>, %arg2: memref<784x128xbf16, #tpu.memory_space<vmem>>, %arg3: memref<1x128xf32, #tpu.memory_space<vmem>>, %arg4: memref<128x64xbf16, #tpu.memory_space<vmem>>, %arg5: memref<1x64xf32, #tpu.memory_space<vmem>>, %arg6: memref<64x128xbf16, #tpu.memory_space<vmem>>, %arg7: memref<1x128xf32, #tpu.memory_space<vmem>>, %arg8: memref<8x128xf32, #tpu.memory_space<vmem>>) attributes {dimension_semantics = [#tpu.dimension_semantics<parallel>], iteration_bounds = array<i64: 1>, scalar_prefetch = 0 : i64, scratch_operands = 0 : i64, tpu.core_type = #tpu.core_type<tc>, window_params = [{transform_indices = @transform_0, window_bounds = array<i64: 8, 784>}, {pipeline_mode = #tpu.pipeline_mode<synchronous>, transform_indices = @transform_1, window_bounds = array<i64: 784, 128>}, {pipeline_mode = #tpu.pipeline_mode<synchronous>, transform_indices = @transform_2, window_bounds = array<i64: 1, 128>}, {pipeline_mode = #tpu.pipeline_mode<synchronous>, transform_indices = @transform_3, window_bounds = array<i64: 128, 64>}, {pipeline_mode = #tpu.pipeline_mode<synchronous>, transform_indices = @transform_4, window_bounds = array<i64: 1, 64>}, {pipeline_mode = #tpu.pipeline_mode<synchronous>, transform_indices = @transform_5, window_bounds = array<i64: 64, 128>}, {pipeline_mode = #tpu.pipeline_mode<synchronous>, transform_indices = @transform_6, window_bounds = array<i64: 1, 128>}, {transform_indices = @transform_7, window_bounds = array<i64: 8, 128>}]} {
    %c0 = arith.constant 0 : index
    %c0_0 = arith.constant 0 : index
    %0 = vector.load %arg1[%c0, %c0_0] : memref<8x784xbf16, #tpu.memory_space<vmem>>, vector<8x784xbf16>
    %c0_1 = arith.constant 0 : index
    %c0_2 = arith.constant 0 : index
    %1 = vector.load %arg2[%c0_1, %c0_2] : memref<784x128xbf16, #tpu.memory_space<vmem>>, vector<784x128xbf16>
    %cst = arith.constant dense<0.000000e+00> : vector<8x128xf32>
    %2 = tpu.matmul %0, %1, %cst {dimension_numbers = #tpu.dot_dimension_numbers<[1], [0], [0], [1], [0, 0, 1, 1], [], []>} : vector<8x784xbf16>, vector<784x128xbf16>, vector<8x128xf32> -> vector<8x128xf32>
    %c0_3 = arith.constant 0 : index
    %c0_4 = arith.constant 0 : index
    %3 = vector.load %arg3[%c0_3, %c0_4] : memref<1x128xf32, #tpu.memory_space<vmem>>, vector<1x128xf32>
    %4 = vector.broadcast %3 : vector<1x128xf32> to vector<8x128xf32>
    %5 = arith.addf %2, %4 : vector<8x128xf32>
    %cst_5 = arith.constant 0.000000e+00 : f32
    %6 = vector.broadcast %cst_5 : f32 to vector<8x128xf32>
    %7 = arith.maximumf %5, %6 : vector<8x128xf32>
    %8 = arith.truncf %7 : vector<8x128xf32> to vector<8x128xbf16>
    %c0_6 = arith.constant 0 : index
    %c0_7 = arith.constant 0 : index
    %9 = vector.load %arg4[%c0_6, %c0_7] : memref<128x64xbf16, #tpu.memory_space<vmem>>, vector<128x64xbf16>
    %cst_8 = arith.constant dense<0.000000e+00> : vector<8x64xf32>
    %10 = tpu.matmul %8, %9, %cst_8 {dimension_numbers = #tpu.dot_dimension_numbers<[1], [0], [0], [1], [0, 0, 1, 1], [], []>} : vector<8x128xbf16>, vector<128x64xbf16>, vector<8x64xf32> -> vector<8x64xf32>
    %c0_9 = arith.constant 0 : index
    %c0_10 = arith.constant 0 : index
    %11 = vector.load %arg5[%c0_9, %c0_10] : memref<1x64xf32, #tpu.memory_space<vmem>>, vector<1x64xf32>
    %12 = vector.broadcast %11 : vector<1x64xf32> to vector<8x64xf32>
    %13 = arith.addf %10, %12 : vector<8x64xf32>
    %cst_11 = arith.constant 0.000000e+00 : f32
    %14 = vector.broadcast %cst_11 : f32 to vector<8x64xf32>
    %15 = arith.maximumf %13, %14 : vector<8x64xf32>
    %16 = arith.truncf %15 : vector<8x64xf32> to vector<8x64xbf16>
    %c0_12 = arith.constant 0 : index
    %c0_13 = arith.constant 0 : index
    %17 = vector.load %arg6[%c0_12, %c0_13] : memref<64x128xbf16, #tpu.memory_space<vmem>>, vector<64x128xbf16>
    %cst_14 = arith.constant dense<0.000000e+00> : vector<8x128xf32>
    %18 = tpu.matmul %16, %17, %cst_14 {dimension_numbers = #tpu.dot_dimension_numbers<[1], [0], [0], [1], [0, 0, 1, 1], [], []>} : vector<8x64xbf16>, vector<64x128xbf16>, vector<8x128xf32> -> vector<8x128xf32>
    %c0_15 = arith.constant 0 : index
    %c0_16 = arith.constant 0 : index
    %19 = vector.load %arg7[%c0_15, %c0_16] : memref<1x128xf32, #tpu.memory_space<vmem>>, vector<1x128xf32>
    %20 = vector.broadcast %19 : vector<1x128xf32> to vector<8x128xf32>
    %21 = arith.addf %18, %20 : vector<8x128xf32>
    %c0_17 = arith.constant 0 : index
    %c0_18 = arith.constant 0 : index
    %22 = vector.load %arg8[%c0_17, %c0_18] : memref<8x128xf32, #tpu.memory_space<vmem>>, vector<8x128xf32>
    tpu.vector_store %arg8[%c0_17, %c0_18], %21 {strides = array<i32>} : memref<8x128xf32, #tpu.memory_space<vmem>>, vector<8x128xf32>,
    return
  }
  func.func @transform_0(%arg0: i32) -> (i32, i32) {
    %c0_i32 = arith.constant 0 : i32
    %c0_i32_0 = arith.constant 0 : i32
    return %arg0, %c0_i32 : i32, i32
  }
  func.func @transform_1(%arg0: i32) -> (i32, i32) {
    %c0_i32 = arith.constant 0 : i32
    %c0_i32_0 = arith.constant 0 : i32
    %c0_i32_1 = arith.constant 0 : i32
    return %c0_i32, %c0_i32_0 : i32, i32
  }
  func.func @transform_2(%arg0: i32) -> (i32, i32) {
    %c0_i32 = arith.constant 0 : i32
    %c0_i32_0 = arith.constant 0 : i32
    %c0_i32_1 = arith.constant 0 : i32
    return %c0_i32, %c0_i32_0 : i32, i32
  }
  func.func @transform_3(%arg0: i32) -> (i32, i32) {
    %c0_i32 = arith.constant 0 : i32
    %c0_i32_0 = arith.constant 0 : i32
    %c0_i32_1 = arith.constant 0 : i32
    return %c0_i32, %c0_i32_0 : i32, i32
  }
  func.func @transform_4(%arg0: i32) -> (i32, i32) {
    %c0_i32 = arith.constant 0 : i32
    %c0_i32_0 = arith.constant 0 : i32
    %c0_i32_1 = arith.constant 0 : i32
    return %c0_i32, %c0_i32_0 : i32, i32
  }
  func.func @transform_5(%arg0: i32) -> (i32, i32) {
    %c0_i32 = arith.constant 0 : i32
    %c0_i32_0 = arith.constant 0 : i32
    %c0_i32_1 = arith.constant 0 : i32
    return %c0_i32, %c0_i32_0 : i32, i32
  }
  func.func @transform_6(%arg0: i32) -> (i32, i32) {
    %c0_i32 = arith.constant 0 : i32
    %c0_i32_0 = arith.constant 0 : i32
    %c0_i32_1 = arith.constant 0 : i32
    return %c0_i32, %c0_i32_0 : i32, i32
  }
  func.func @transform_7(%arg0: i32) -> (i32, i32) {
    %c0_i32 = arith.constant 0 : i32
    %c0_i32_0 = arith.constant 0 : i32
    return %arg0, %c0_i32 : i32, i32
  }
}

</mosaic_0001>

<bundles_post_ra>
// kernel: neural_net_forward.1
= control target key start
LH: loop header
LB: loop body
LE: loop exit
PB: predicated region body
PF: predicated region fallthrough
CT: control target
= control target key end

     0   :  { %vm451_vm0 = vcmask 130048   ;;  %vm667_vm1 = vcmask 523264   ;;  %s1246_s1 = inlined_call_operand.vmem [shape: bf16[784,128], index: 1, kind: input, shape index: {}]   ;;  %s1247_s2 = inlined_call_operand.vmem [shape: f32[1,128], index: 2, kind: input, shape index: {}]   ;;  %s1248_s0 = inlined_call_operand.vmem [shape: bf16[8,784], index: 0, kind: input, shape index: {}]   ;;  %s1249_s4 = inlined_call_operand.vmem [shape: f32[1,64], index: 4, kind: input, shape index: {}]   ;;  %s1250_s3 = inlined_call_operand.vmem [shape: bf16[128,64], index: 3, kind: input, shape index: {}]   ;;  %s1251_s5 = inlined_call_operand.vmem [shape: bf16[64,128], index: 5, kind: input, shape index: {}]   ;;  %s1252_s6 = inlined_call_operand.vmem [shape: f32[1,128], index: 6, kind: input, shape index: {}]   ;;  %s1253_s7 = inlined_call_operand.vmem [shape: f32[8,128], index: 7, kind: output, shape index: {}]  }
   0x1   :  { %v942_v0 = vld [vmem:[%s1246_s1 + $0x38] sm:$0xff]  ;;  %v941_v3 = vld [vmem:[%s1246_s1 + $0x30] sm:$0xff]  ;;  %v940_v8 = vld [vmem:[%s1246_s1 + $0x28] sm:$0xff] }
   0x2   :  { %v950_v1 = vld [vmem:[%s1246_s1 + $0x78] sm:$0xff]  ;;  %455 = vmatpush.bf16.msra.mxu0 %v942_v0  ;;  %v949_v4 = vld [vmem:[%s1246_s1 + $0x70] sm:$0xff]  ;;  %v948_v9 = vld [vmem:[%s1246_s1 + $0x68] sm:$0xff] }
   0x3   :  { %v958_v2 = vld [vmem:[%s1246_s1 + $0xb8] sm:$0xff]  ;;  %468 = vmatpush.bf16.msra.mxu1 %v950_v1  ;;  %v957_v5 = vld [vmem:[%s1246_s1 + $0xb0] sm:$0xff]  ;;  %v956_v10 = vld [vmem:[%s1246_s1 + $0xa8] sm:$0xff] }
   0x4   :  { %481 = vmatpush.bf16.msra.mxu2 %v958_v2  ;;  %v966_v6 = vld [vmem:[%s1246_s1 + $0xf8] sm:$0xff]  ;;  %v965_v7 = vld [vmem:[%s1246_s1 + $0xf0] sm:$0xff]  ;;  %v964_v11 = vld [vmem:[%s1246_s1 + $0xe8] sm:$0xff] }
   0x5   :  { %494 = vmatpush.bf16.msra.mxu3 %v966_v6  ;;  %v939_v12 = vld [vmem:[%s1246_s1 + $0x20] sm:$0xff]  ;;  %v938_v16 = vld [vmem:[%s1246_s1 + $0x18] sm:$0xff]  ;;  %v937_v20 = vld [vmem:[%s1246_s1 + $0x10] sm:$0xff] }
   0x6   :  { %456 = vmatpush.bf16.msra.mxu0 %v941_v3  ;;  %v947_v13 = vld [vmem:[%s1246_s1 + $0x60] sm:$0xff]  ;;  %v946_v17 = vld [vmem:[%s1246_s1 + $0x58] sm:$0xff]  ;;  %v945_v21 = vld [vmem:[%s1246_s1 + $0x50] sm:$0xff] }
   0x7   :  { %469 = vmatpush.bf16.msra.mxu1 %v949_v4  ;;  %v955_v14 = vld [vmem:[%s1246_s1 + $0xa0] sm:$0xff]  ;;  %v954_v18 = vld [vmem:[%s1246_s1 + $0x98] sm:$0xff]  ;;  %v953_v22 = vld [vmem:[%s1246_s1 + $0x90] sm:$0xff] }
   0x8   :  { %482 = vmatpush.bf16.msra.mxu2 %v957_v5  ;;  %v963_v15 = vld [vmem:[%s1246_s1 + $0xe0] sm:$0xff]  ;;  %v962_v19 = vld [vmem:[%s1246_s1 + $0xd8] sm:$0xff]  ;;  %v961_v23 = vld [vmem:[%s1246_s1 + $0xd0] sm:$0xff] }
   0x9   :  { %495 = vmatpush.bf16.msra.mxu3 %v965_v7  ;;  %v936_v24 = vld [vmem:[%s1246_s1 + $0x8] sm:$0xff]  ;;  %v27_v26 = vld [vmem:[%s1248_s0] sm:$0xff]  ;;  %v974_v34 = vld [vmem:[%s1246_s1 + $0x138] sm:$0xff] }
   0xa   :  { %457 = vmatpush.bf16.msra.mxu0 %v940_v8  ;;  %v944_v25 = vld [vmem:[%s1246_s1 + $0x48] sm:$0xff]  ;;  %v137_v29 = vunpack.c.l.b16 %v27_v26  ;;  %v138_v31 = vunpack.c.h.b16 %v27_v26  ;;  %v935_v32 = vld [vmem:[%s1246_s1] sm:$0xff]  ;;  %v982_v35 = vld [vmem:[%s1246_s1 + $0x178] sm:$0xff] }
   0xb   :  { %470 = vmatpush.bf16.msra.mxu1 %v948_v9  ;;  %v952_v27 = vld [vmem:[%s1246_s1 + $0x88] sm:$0xff]  ;;  %v943_v33 = vld [vmem:[%s1246_s1 + $0x40] sm:$0xff]  ;;  %v973_v43 = vld [vmem:[%s1246_s1 + $0x130] sm:$0xff] }
   0xc   :  { %483 = vmatpush.bf16.msra.mxu2 %v956_v10  ;;  %v28_v28 = vld [vmem:[%s1248_s0 + $0x8] sm:$0xff]  ;;  %v951_v36 = vld [vmem:[%s1246_s1 + $0x80] sm:$0xff]  ;;  %v144_v38 = vpack.c.b16 %v137_v29, %v137_v29  ;;  %v145_v39 = vpack.c.b16 %v138_v31, %v138_v31  ;;  %v981_v44 = vld [vmem:[%s1246_s1 + $0x170] sm:$0xff] }
   0xd   :  { %496 = vmatpush.bf16.msra.mxu3 %v964_v11  ;;  %v960_v30 = vld [vmem:[%s1246_s1 + $0xc8] sm:$0xff]  ;;  %v139_v37 = vunpack.c.l.b16 %v28_v28  ;;  %v140_v40 = vunpack.c.h.b16 %v28_v28  ;;  %v959_v41 = vld [vmem:[%s1246_s1 + $0xc0] sm:$0xff]  ;;  %v30_v51 = vld [vmem:[%s1248_s0 + $0x18] sm:$0xf] }
   0xe   :  { %458 = vmatpush.bf16.msra.mxu0 %v939_v12  ;;  %v983_v42 = vld [vmem:[%s1246_s1 + $0x180] sm:$0xff]  ;;  %v972_v47 = vld [vmem:[%s1246_s1 + $0x128] sm:$0xff]  ;;  %v970_v52 = vld [vmem:[%s1246_s1 + $0x118] sm:$0xff]  ;;  %v143_v54 = vunpack.c.l.b16 %v30_v51 }
   0xf   :  { %471 = vmatpush.bf16.msra.mxu1 %v947_v13  ;;  %v146_v45 = vpack.c.b16 %v139_v37, %v139_v37  ;;  %v147_v46 = vpack.c.b16 %v140_v40, %v140_v40  ;;  %v980_v48 = vld [vmem:[%s1246_s1 + $0x168] sm:$0xff]  ;;  %v971_v49 = vld [vmem:[%s1246_s1 + $0x120] sm:$0xff]  ;;  %v978_v53 = vld [vmem:[%s1246_s1 + $0x158] sm:$0xff] }
  0x10   :  { %484 = vmatpush.bf16.msra.mxu2 %v955_v14  ;;  %v979_v50 = vld [vmem:[%s1246_s1 + $0x160] sm:$0xff]  ;;  %v969_v55 = vld [vmem:[%s1246_s1 + $0x110] sm:$0xff]  ;;  %v150_v57 = vpack.c.b16 %v143_v54, %v143_v54  ;;  %v968_v58 = vld [vmem:[%s1246_s1 + $0x108] sm:$0xff] }
  0x11   :  { %497 = vmatpush.bf16.msra.mxu3 %v963_v15  ;;  %v977_v56 = vld [vmem:[%s1246_s1 + $0x150] sm:$0xff]  ;;  %v976_v59 = vld [vmem:[%s1246_s1 + $0x148] sm:$0xff]  ;;  %v967_v63 = vld [vmem:[%s1246_s1 + $0x100] sm:$0xff] }
  0x12   :  { %459 = vmatpush.bf16.msra.mxu0 %v938_v16  ;;  %v29_v60 = vld [vmem:[%s1248_s0 + $0x10] sm:$0xff]  ;;  %v975_v0 = vld [vmem:[%s1246_s1 + $0x140] sm:$0xff]  ;;  %v991_v3 = vld [vmem:[%s1250_s3 + $0x38] sm:$0xff] }
  0x13   :  { %472 = vmatpush.bf16.msra.mxu1 %v946_v17  ;;  %v141_v61 = vunpack.c.l.b16 %v29_v60  ;;  %v142_v62 = vunpack.c.h.b16 %v29_v60  ;;  %v990_v4 = vld [vmem:[%s1250_s3 + $0x30] sm:$0xff]  ;;  %v989_v5 = vld [vmem:[%s1250_s3 + $0x28] sm:$0xff]  ;;  %v988_v6 = vld [vmem:[%s1250_s3 + $0x20] sm:$0xff] }
  0x14   :  { %485 = vmatpush.bf16.msra.mxu2 %v954_v18  ;;  %v987_v7 = vld [vmem:[%s1250_s3 + $0x18] sm:$0xff]  ;;  %v986_v8 = vld [vmem:[%s1250_s3 + $0x10] sm:$0xff]  ;;  %v985_v9 = vld [vmem:[%s1250_s3 + $0x8] sm:$0xff] }
  0x15   :  { %498 = vmatpush.bf16.msra.mxu3 %v962_v19  ;;  %v148_v1 = vpack.c.b16 %v141_v61, %v141_v61  ;;  %v149_v2 = vpack.c.b16 %v142_v62, %v142_v62  ;;  %v984_v12 = vld [vmem:[%s1250_s3] sm:$0xff]  ;;  %v995_v15 = vld [vmem:[%s1251_s5 + $0x18] sm:$0xff]  ;;  %v994_v18 = vld [vmem:[%s1251_s5 + $0x10] sm:$0xff] }
  0x16   :  { %460 = vmatpush.bf16.msra.mxu0 %v937_v20  ;;  %v996_v19 = vld [vmem:[%s1247_s2] ss:$0 sm:$0xff]  ;;  %v993_v20 = vld [vmem:[%s1251_s5 + $0x8] sm:$0xff] }
  0x17   :  { %473 = vmatpush.bf16.msra.mxu1 %v945_v21 }
  0x18   :  { %486 = vmatpush.bf16.msra.mxu2 %v953_v22 }
  0x19   :  { %499 = vmatpush.bf16.msra.mxu3 %v961_v23 }
  0x1a   :  { %461 = vmatpush.bf16.msra.mxu0 %v936_v24 }
  0x1b   :  { %474 = vmatpush.bf16.msra.mxu1 %v944_v25 }
  0x1c   :  { %487 = vmatpush.bf16.msra.mxu2 %v952_v27 }
  0x1d   :  { %500 = vmatpush.bf16.msra.mxu3 %v960_v30 }
  0x1e   :  { %462 = vmatpush.bf16.msra.mxu0 %v935_v32 }
  0x1f   :  { %475 = vmatpush.bf16.msra.mxu1 %v943_v33 }
  0x20   :  { %488 = vmatpush.bf16.msra.mxu2 %v951_v36 }
  0x21   :  { %463 = vmatmul.bf16.vlgmr.msra.gmra.mxu0 %v144_v38  ;;  %501 = vmatpush.bf16.msra.mxu3 %v959_v41  ;;  %v992_v38 = vld [vmem:[%s1251_s5] sm:$0xff] }
  0x22   :  { %507 = vmatpush.bf16.msrb.mxu0 %v974_v34  ;;  %476 = vmatmul.bf16.vlgmr.msra.gmra.mxu1 %v145_v39  ;;  %v997_v39 = vld [vmem:[%s1249_s4] ss:$0 sm:$0xff] }
  0x23   :  { %520 = vmatpush.bf16.msrb.mxu1 %v982_v35  ;;  %489 = vmatmul.bf16.vlgmr.msra.gmra.mxu2 %v146_v45  ;;  %v998_v45 = vld [vmem:[%s1252_s6] ss:$0 sm:$0xff] }
  0x24   :  { %540 = vmatpush.bf16.msrb.mxu2 %v983_v42  ;;  %502 = vmatmul.bf16.vlgmr.msra.gmra.mxu3 %v147_v46 }
  0x25   :  { %616 = vmatpush.bf16.msrb.mxu3 %v991_v3 }
  0x26   :  { %508 = vmatpush.bf16.msrb.mxu0 %v973_v43 }
  0x27   :  { %521 = vmatpush.bf16.msrb.mxu1 %v981_v44 }
  0x28   :  { %675 = vmatpush.bf16.msra.mxu2 %v995_v15 }
  0x29   :  { %617 = vmatpush.bf16.msrb.mxu3 %v990_v4 }
  0x2a   :  { %509 = vmatpush.bf16.msrb.mxu0 %v972_v47 }
  0x2b   :  { %522 = vmatpush.bf16.msrb.mxu1 %v980_v48 }
  0x2c   :  { %676 = vmatpush.bf16.msra.mxu2 %v994_v18 }
  0x2d   :  { %618 = vmatpush.bf16.msrb.mxu3 %v989_v5 }
  0x2e   :  { %510 = vmatpush.bf16.msrb.mxu0 %v971_v49 }
  0x2f   :  { %523 = vmatpush.bf16.msrb.mxu1 %v979_v50 }
  0x30   :  { %677 = vmatpush.bf16.msra.mxu2 %v993_v20 }
  0x31   :  { %619 = vmatpush.bf16.msrb.mxu3 %v988_v6 }
  0x32   :  { %511 = vmatpush.bf16.msrb.mxu0 %v970_v52 }
  0x33   :  { %524 = vmatpush.bf16.msrb.mxu1 %v978_v53  ;;  %885 = vmatmul.msk.bf16.vlgmr.msrb.gmra.mxu2 %vm451_vm0, %v150_v57 }
  0x34   :  { %678 = vmatpush.bf16.msra.mxu2 %v992_v38 }
  0x35   :  { %620 = vmatpush.bf16.msrb.mxu3 %v987_v7 }
  0x36   :  { %512 = vmatpush.bf16.msrb.mxu0 %v969_v55 }
  0x37   :  { %525 = vmatpush.bf16.msrb.mxu1 %v977_v56 }
  0x39   :  { %621 = vmatpush.bf16.msrb.mxu3 %v986_v8 }
  0x3a   :  { %513 = vmatpush.bf16.msrb.mxu0 %v968_v58 }
  0x3b   :  { %526 = vmatpush.bf16.msrb.mxu1 %v976_v59 }
  0x3d   :  { %622 = vmatpush.bf16.msrb.mxu3 %v985_v9 }
  0x3e   :  { %514 = vmatpush.bf16.msrb.mxu0 %v967_v63 }
  0x3f   :  { %527 = vmatpush.bf16.msrb.mxu1 %v975_v0 }
  0x41   :  { %515 = vmatmul.bf16.vlgmr.msrb.gmra.mxu0 %v148_v1  ;;  %623 = vmatpush.bf16.msrb.mxu3 %v984_v12 }
  0x42   :  { %528 = vmatmul.bf16.vlgmr.msrb.gmra.mxu1 %v149_v2 }
  0x9e   :  { %v464_v10 = vpop.f32.mrf.mxu0 }
  0x9f   :  { %v477_v11 = vpop.f32.mrf.mxu1  ;;  %v465_v21 = vadd.f32 %v996_v19, %v464_v10 }
  0xa1   :  { %v478_v24 = vadd.f32 %v477_v11, %v465_v21 }
  0xa6   :  { %v466_v13 = vpop.f32.mrf.mxu0  ;;  %v490_v16 = vpop.f32.mrf.mxu2 }
  0xa7   :  { %v479_v14 = vpop.f32.mrf.mxu1  ;;  %v503_v17 = vpop.f32.mrf.mxu3  ;;  %v491_v25 = vadd.f32 %v490_v16, %v478_v24 }
  0xa9   :  { %v504_v27 = vadd.f32 %v503_v17, %v491_v25 }
  0xae   :  { %v492_v22 = vpop.f32.mrf.mxu2 }
  0xaf   :  { %v505_v23 = vpop.f32.mrf.mxu3 }
  0xb6   :  { %v542_v26 = vpop.f32.mrf.mxu2 }
  0xbe   :  { %v516_v28 = vpop.f32.mrf.mxu0  ;;  %v544_v32 = vpop.f32.mrf.mxu2 }
  0xbf   :  { %v529_v29 = vpop.f32.mrf.mxu1  ;;  %v517_v30 = vadd.f32 %v516_v28, %v504_v27 }
  0xc1   :  { %v530_v31 = vadd.f32 %v529_v29, %v517_v30 }
  0xc3   :  { %v543_v33 = vadd.f32 %v542_v26, %v530_v31 }
  0xc5   :  { %v546_v34 = vmax.f32 %v543_v33, 0.0 }
  0xc6   :  { %v518_v35 = vpop.f32.mrf.mxu0 }
  0xc7   :  { %v531_v36 = vpop.f32.mrf.mxu1  ;;  %v547_v37 = vpack.c.bf16 %v546_v34, %v546_v34 }
  0xc9   :  { %624 = vmatmul.bf16.vlgmr.msrb.gmra.mxu3 %v547_v37 }
 0x14c   :  { %v625_v40 = vpop.f32.mrf.mxu3 }
 0x14d   :  { %v626_v41 = vadd.f32 %v997_v39, %v625_v40 }
 0x14f   :  { %v629_v42 = vmax.f32 %v626_v41, 0.0 }
 0x151   :  { %v630_v43 = vpack.c.bf16 %v629_v42, %v629_v42 }
 0x153   :  { %934 = vmatmul.msk.bf16.vlgmr.msra.gmra.mxu2 %vm667_vm1, %v630_v43 }
 0x154   :  { %v627_v44 = vpop.f32.mrf.mxu3 }
 0x1d6   :  { %v680_v46 = vpop.f32.mrf.mxu2 }
 0x1d7   :  { %v681_v47 = vadd.f32 %v998_v45, %v680_v46 }
 0x1d9   :  { %684 = vst [vmem:[%s1253_s7] sm:$0xff] %v681_v47 }
 0x1de   :  { %v682_v48 = vpop.f32.mrf.mxu2 }

</bundles_post_ra>
